<compile_context>
chip_gen: v7x
topology: tpu7x:2x2x1
jax: 0.10.0
libtpu: 0.0.40
codegen_flags: <defaults>
</compile_context>

<pallas_src>
import functools

import jax
import jax.numpy as jnp
import numpy as np
from jax.experimental import pallas as pl
from jax.experimental.pallas import tpu as pltpu


def _round_up(a, b):
    return (a + b - 1) // b * b


def _cdiv(a, b):
    return (a + b - 1) // b


def _state_loss_kernel(x_ref, gs_t_ref, bias_ref, comb_ref, tgt_ref, nm_ref,
                       known_ref, gsum_ref, cnt_ref, *,
                       num_groups, block_b, batch):
    i = pl.program_id(0)
    R = num_groups

    # effective_evidence = x @ global_states[:W]^T + 1, with padded W columns pushed to
    # -1e30 by the precomputed bias row (no in-kernel iota/where masking pass).
    ee = jnp.dot(x_ref[...], gs_t_ref[...],
                 preferred_element_type=jnp.float32) + bias_ref[...]    # [Bt, Wp] f32
    bt, wp = ee.shape

    # Target logit via iota compare — done before the exp so ee's live range ends there.
    col = jax.lax.broadcasted_iota(jnp.int32, (bt, wp), 1)
    tgt_val = jnp.sum(jnp.where(col == tgt_ref[...], ee, 0.0),
                      axis=1, keepdims=True)                            # [Bt, 1]

    # Single exp pass over [Bt, Wp]; every reduction below reuses `e`.
    m_all = jnp.max(ee, axis=1, keepdims=True)                          # [Bt, 1]
    e = jnp.exp(ee - m_all)                                             # [Bt, Wp] f32

    # Fused reduction: columns of comb are [rel masks | first-elem masks | ones | 0-pad]
    # so ONE lane-dense MXU matmul yields group_sum, first_exp and the softmax
    # denominator.  Operands are cast to comb's dtype (bf16 by default; 0/1 masks are
    # exact, f32 accumulation on the MXU).
    red = jnp.dot(e.astype(comb_ref.dtype), comb_ref[...],
                  preferred_element_type=jnp.float32)                   # [Bt, R_comb]
    group_sum = red[:, :R]                                              # [Bt, R]
    first_exp = red[:, R:2 * R]                                         # [Bt, R]
    sum_all = red[:, 2 * R:2 * R + 1]                                   # [Bt, 1]

    # Valid-row mask (handles batch padding of the last tile).
    row = jax.lax.broadcasted_iota(jnp.int32, (bt, 1), 0) + i * block_b
    valid = (row < batch).astype(jnp.float32)                           # [Bt, 1]

    # Known-loss numerator: sum of (logsumexp - target_logit) over valid rows.
    known = jnp.sum(valid * (m_all + jnp.log(sum_all) - tgt_val),
                    axis=0, keepdims=True)                              # [1, 1]

    # Per-group -log_softmax(group)[first] = log(group_sum) - log(first_exp).
    # TODO(synk): the exp shift is the global row max; if an entire target-relevant
    # group sits ~88+ (f32) below it, both terms underflow and the contribution is
    # silently dropped (the reference shifts by the group's own max). The clamp only
    # guards log(0).
    tiny = jnp.float32(1e-37)
    term = (jnp.log(jnp.maximum(group_sum, tiny))
            - jnp.log(jnp.maximum(first_exp, tiny)))                    # [Bt, R]

    nm = nm_ref[...] * valid                                            # [Bt, R]
    known_ref[...] = known[None]                                        # [1, 1, 1]
    gsum_ref[...] = jnp.sum(nm * term, axis=0, keepdims=True)[None]     # [1, 1, R]
    cnt_ref[...] = jnp.sum(nm, axis=0, keepdims=True)[None]             # [1, 1, R]


def state_loss_forward(x, target, T, cfg, *, block_b=512, use_bf16=True,
                       mask_bf16=True):
    """Plain-JAX glue: pads/packs taxonomy data, launches the tiled kernel, finalizes."""
    W = len(T['wnids'])
    R = len(T['relevant'])
    x = jnp.asarray(x, jnp.float32)
    B, D = x.shape

    compute_dtype = jnp.bfloat16 if use_bf16 else jnp.float32
    mask_dtype = jnp.bfloat16 if mask_bf16 else jnp.float32
    itemsize = 2 if use_bf16 else 4
    mask_itemsize = 2 if mask_bf16 else 4
    sub = 16 if use_bf16 else 8                 # sublane granule for the compute dtype

    # Lane / K alignment: W (lane dim of ee) and D (MXU contraction dim) padded to 128;
    # the fused mask matrix is padded to a lane-dense 128 columns.
    W_pad = _round_up(W, 128)
    D_pad = _round_up(D, 128)
    R_comb = _round_up(2 * R + 1, 128)

    # ---- VMEM-budget-aware batch tile (64 MiB/TC on v7x, 128 MiB on v5e/v6e) --------
    try:
        vmem_cap = int(pltpu.get_tpu_info().vmem_capacity_bytes)
    except Exception:                     # conservative default: v7x per-TensorCore
        vmem_cap = 64 * 2**20
    if not vmem_cap or vmem_cap <= 0:
        vmem_cap = 64 * 2**20

    # Resident blocks are still double-buffered by the pipeline (constant index_map).
    # TODO(synk): single-buffer them via pipeline_mode=pl.Buffered(1) for extra v7x
    # headroom once that path is exercised here.
    resident = 2 * (D_pad * W_pad * itemsize
                    + W_pad * R_comb * mask_itemsize
                    + W_pad * 4)
    budget = max(int(0.70 * vmem_cap) - resident - (2 << 20), 1 << 20)
    # Per-batch-row cost: double-buffered x/tgt/nm tiles + ~6 live f32 [*, W_pad]
    # temporaries + the fused-reduction result.
    per_row = (2 * D_pad * itemsize + 2 * (1 + R) * 4
               + 6 * W_pad * 4 + R_comb * 4)
    bt_cap = max(sub, (budget // per_row) // sub * sub)

    Bt = _round_up(max(sub, min(block_b, bt_cap, _round_up(B, sub))), sub)
    # Give megacore (2 TCs on v7x) at least two batch tiles whenever the batch allows.
    if B > sub and _cdiv(B, Bt) < 2:
        Bt = max(sub, _round_up(_cdiv(B, 2), sub))
    B_pad = _round_up(B, Bt)
    num_tiles = B_pad // Bt

    # ---- host-side packing of taxonomy constants -------------------------------------
    # global_states[:W]^T, zero-padded to [D_pad, W_pad].
    gs = np.asarray(T['global_states'], np.float32)[:W]                 # [W, D]
    gs_t_np = np.zeros((D_pad, W_pad), np.float32)
    gs_t_np[:D, :W] = gs.T
    gs_t = jnp.asarray(gs_t_np, compute_dtype)

    # Precomputed bias row: +1.0 (the original "+ 1") on valid columns, -1e30 on padded
    # columns — replaces the per-tile iota/compare/select masking pass.
    bias_np = np.full((1, W_pad), -1e30, np.float32)
    bias_np[0, :W] = 1.0
    bias = jnp.asarray(bias_np)

    # Combined reduction mask: [rel membership | first-of-group | all-ones | zero pad].
    comb_np = np.zeros((W_pad, R_comb), np.float32)
    for gi, rel in enumerate(T['relevant']):
        rel_idx = np.asarray(rel).reshape(-1)
        comb_np[rel_idx, gi] = 1.0
        comb_np[int(rel_idx[0]), R + gi] = 1.0
    comb_np[:W, 2 * R] = 1.0
    comb = jnp.asarray(comb_np, mask_dtype)

    # Per-row inputs, padded on the batch dim (padded rows are masked in-kernel).
    tgt = jnp.asarray(target, jnp.int32)
    x_pad = jnp.zeros((B_pad, D_pad), compute_dtype).at[:B, :D].set(
        x.astype(compute_dtype))
    tgt_pad = jnp.zeros((B_pad, 1), jnp.int32).at[:B, 0].set(tgt)
    labels_rel = jnp.asarray(T['labels_relevant'].astype(np.float32))   # [classes, R]
    nm_pad = jnp.zeros((B_pad, R), jnp.float32).at[:B].set(labels_rel[tgt])

    kernel = functools.partial(_state_loss_kernel,
                               num_groups=R, block_b=Bt, batch=B)

    vmem_est = (resident
                + 2 * Bt * D_pad * itemsize          # x tiles
                + 2 * Bt * (1 + R) * 4               # target + novel-mask tiles
                + 6 * Bt * W_pad * 4                 # ee / e temporaries, headroom
                + Bt * R_comb * 4                    # fused-reduction result
                + (2 << 20))
    vmem_limit = int(min(max(vmem_est, 16 * 2**20), int(0.9 * vmem_cap)))

    grid_spec = pltpu.PrefetchScalarGridSpec(
        num_scalar_prefetch=0,
        grid=(num_tiles,),
        in_specs=[
            pl.BlockSpec((Bt, D_pad), lambda i: (i, 0)),        # x tile
            pl.BlockSpec((D_pad, W_pad), lambda i: (0, 0)),     # gs_t (resident)
            pl.BlockSpec((1, W_pad), lambda i: (0, 0)),         # bias row (resident)
            pl.BlockSpec((W_pad, R_comb), lambda i: (0, 0)),    # fused masks (resident)
            pl.BlockSpec((Bt, 1), lambda i: (i, 0)),            # target column
            pl.BlockSpec((Bt, R), lambda i: (i, 0)),            # novel mask tile
        ],
        out_specs=[
            pl.BlockSpec((1, 1, 1), lambda i: (i, 0, 0)),       # known partial
            pl.BlockSpec((1, 1, R), lambda i: (i, 0, 0)),       # per-group numerators
            pl.BlockSpec((1, 1, R), lambda i: (i, 0, 0)),       # per-group counts
        ],
    )
    # TODO(synk): packing the three partials into one 128-lane output row would drop two
    # output pipelines; kept separate to avoid an unaligned in-kernel lane concat.

    known_p, gsum_p, cnt_p = pl.pallas_call(
        kernel,
        out_shape=(jax.ShapeDtypeStruct((num_tiles, 1, 1), jnp.float32),
                   jax.ShapeDtypeStruct((num_tiles, 1, R), jnp.float32),
                   jax.ShapeDtypeStruct((num_tiles, 1, R), jnp.float32)),
        grid_spec=grid_spec,
        compiler_params=pltpu.CompilerParams(
            dimension_semantics=("parallel",),
            vmem_limit_bytes=vmem_limit),
    )(x_pad, gs_t, bias, comb, tgt_pad, nm_pad)

    # Tiny finalize in plain JAX: accumulate numerators/counts across tiles, then apply
    # the cnt>0 guard, per-group means, class weights and loss weights.
    gsum = jnp.sum(gsum_p, axis=(0, 1))                                 # [R]
    cnt = jnp.sum(cnt_p, axis=(0, 1))                                   # [R]
    # Uniform class weights, matching the reference (ones(ch_slice[-1]) / ch_slice[-1]).
    cw = jnp.full((R,), 1.0 / float(T['ch_slice'][-1]), jnp.float32)
    novel = jnp.sum(jnp.where(cnt > 0, gsum / jnp.maximum(cnt, 1.0), 0.0) * cw)
    known = jnp.sum(known_p) / B
    return float(cfg['NOVELWEIGHT']) * novel + float(cfg['KNOWNWEIGHT']) * known


# -------------------------- pure-numpy reference ---------------------------------
def _logsumexp(a, axis=-1, keepdims=True):
    m = a.max(axis=axis, keepdims=True)
    out = m + np.log(np.exp(a - m).sum(axis=axis, keepdims=True))
    return out if keepdims else np.squeeze(out, axis)


def state_loss_reference(x, target, T, cfg):
    gs = T['global_states'].astype(np.float32)
    new_input = (gs @ x.T).T + 1.0
    W = len(T['wnids'])
    ee = new_input[:, :W]
    target_novel = T['labels_relevant'][target]
    cw = np.ones(T['ch_slice'][-1], np.float32) / T['ch_slice'][-1]
    loss = 0.0
    for i, rel in enumerate(T['relevant']):
        if target_novel[:, i].any():
            loc = np.nonzero(target_novel[:, i])[0]
            sub = ee[loc][:, rel]
            logsm = sub - _logsumexp(sub, axis=1)
            loss += -logsm[:, 0].mean() * cw[i]
    loss *= cfg['NOVELWEIGHT']
    logsm_all = ee - _logsumexp(ee, axis=1)
    ce = -logsm_all[np.arange(len(target)), target].mean()
    loss += cfg['KNOWNWEIGHT'] * ce
    return np.float32(loss)


if __name__ == "__main__":
    # batch, feat dim, num wnids, num global states, num relevant groups
    B, D, W, S, R = 24, 32, 16, 20, 4

    key = jax.random.PRNGKey(0)
    kx, kg, kt, kl = jax.random.split(key, 4)

    x = jax.random.normal(kx, (B, D), jnp.float32)
    global_states = jax.random.normal(kg, (S, D), jnp.float32)
    target = jax.random.randint(kt, (B,), 0, W)

    # Pre-round inputs to bf16-representable f32 so the bf16-fed kernel and the f32
    # numpy reference see identical operand values (checks kernel logic, not
    # quantization noise of the main matmul).
    x = x.astype(jnp.bfloat16).astype(jnp.float32)
    global_states = np.asarray(
        global_states.astype(jnp.bfloat16).astype(jnp.float32))

    # Deterministic synthetic taxonomy T (shapes match what __init__ expects).
    relevant = [np.array([12, 0, 1, 2]),
                np.array([13, 3, 4]),
                np.array([14, 5, 6, 7, 8]),
                np.array([15, 9, 10])]
    labels_relevant = np.asarray(
        jax.random.bernoulli(kl, 0.4, (W, R))).astype(np.uint8)      # [num_classes, R]
    T = {
        'wnids': list(range(W)),
        'global_states': global_states,
        'relevant': relevant,
        'labels_relevant': labels_relevant,
        'ch_slice': [0, 1, 2, 3, R],
        'root': 0,
        'is_ancestor_mat': np.zeros((W, W), bool),   # unused in forward
    }
    cfg = {'NOVELWEIGHT': 2.0, 'KNOWNWEIGHT': 0.5}

    ref = state_loss_reference(np.asarray(x), np.asarray(target), T, cfg)

    # block_b=16 -> 2 batch tiles (exercises the grid, batch padding & finalize).
    # Default fast path: bf16 operands on the fused mask-reduction matmul; tolerance
    # covers the <= 2^-9 rounding of exp(ee - m) before the logs.
    loss = state_loss_forward(x, target, T, cfg, block_b=16,
                              use_bf16=True, mask_bf16=True)
    loss = jax.block_until_ready(loss)
    np.testing.assert_allclose(np.asarray(loss), ref, rtol=2e-3, atol=1e-2)

    # Precision-neutral mode (f32 operands for the fused mask matmul): tight check.
    loss_exact = state_loss_forward(x, target, T, cfg, block_b=16,
                                    use_bf16=True, mask_bf16=False)
    loss_exact = jax.block_until_ready(loss_exact)
    np.testing.assert_allclose(np.asarray(loss_exact), ref, rtol=2e-4, atol=2e-4)

    print("KERNEL_OK")
</pallas_src>

<mosaic_0001>
module attributes {stable_mosaic.version = 11 : i64} {
  func.func @_state_loss_kernel(%arg0: i32, %arg1: memref<16x128xbf16, #tpu.memory_space<vmem>>, %arg2: memref<128x128xbf16, #tpu.memory_space<vmem>>, %arg3: memref<1x128xf32, #tpu.memory_space<vmem>>, %arg4: memref<128x128xbf16, #tpu.memory_space<vmem>>, %arg5: memref<16x1xi32, #tpu.memory_space<vmem>>, %arg6: memref<16x4xf32, #tpu.memory_space<vmem>>, %arg7: memref<1x1x1xf32, #tpu.memory_space<vmem>>, %arg8: memref<1x1x4xf32, #tpu.memory_space<vmem>>, %arg9: memref<1x1x4xf32, #tpu.memory_space<vmem>>) attributes {dimension_semantics = [#tpu.dimension_semantics<parallel>], iteration_bounds = array<i64: 2>, scalar_prefetch = 0 : i64, scratch_operands = 0 : i64, tpu.core_type = #tpu.core_type<tc>, window_params = [{transform_indices = @transform_0, window_bounds = array<i64: 16, 128>}, {pipeline_mode = #tpu.pipeline_mode<synchronous>, transform_indices = @transform_1, window_bounds = array<i64: 128, 128>}, {pipeline_mode = #tpu.pipeline_mode<synchronous>, transform_indices = @transform_2, window_bounds = array<i64: 1, 128>}, {pipeline_mode = #tpu.pipeline_mode<synchronous>, transform_indices = @transform_3, window_bounds = array<i64: 128, 128>}, {transform_indices = @transform_4, window_bounds = array<i64: 16, 1>}, {transform_indices = @transform_5, window_bounds = array<i64: 16, 4>}, {transform_indices = @transform_6, window_bounds = array<i64: 1, 1, 1>}, {transform_indices = @transform_7, window_bounds = array<i64: 1, 1, 4>}, {transform_indices = @transform_8, window_bounds = array<i64: 1, 1, 4>}]} {
    %c0 = arith.constant 0 : index
    %c0_0 = arith.constant 0 : index
    %0 = vector.load %arg1[%c0, %c0_0] : memref<16x128xbf16, #tpu.memory_space<vmem>>, vector<16x128xbf16>
    %c0_1 = arith.constant 0 : index
    %c0_2 = arith.constant 0 : index
    %1 = vector.load %arg2[%c0_1, %c0_2] : memref<128x128xbf16, #tpu.memory_space<vmem>>, vector<128x128xbf16>
    %cst = arith.constant dense<0.000000e+00> : vector<16x128xf32>
    %2 = tpu.matmul %0, %1, %cst {dimension_numbers = #tpu.dot_dimension_numbers<[1], [0], [0], [1], [0, 0, 1, 1], [], []>} : vector<16x128xbf16>, vector<128x128xbf16>, vector<16x128xf32> -> vector<16x128xf32>
    %c0_3 = arith.constant 0 : index
    %c0_4 = arith.constant 0 : index
    %3 = vector.load %arg3[%c0_3, %c0_4] : memref<1x128xf32, #tpu.memory_space<vmem>>, vector<1x128xf32>
    %4 = vector.broadcast %3 : vector<1x128xf32> to vector<16x128xf32>
    %5 = arith.addf %2, %4 : vector<16x128xf32>
    %6 = tpu.iota {dimensions = array<i32: 1>} : vector<16x128xi32>
    %c0_5 = arith.constant 0 : index
    %c0_6 = arith.constant 0 : index
    %7 = vector.load %arg5[%c0_5, %c0_6] : memref<16x1xi32, #tpu.memory_space<vmem>>, vector<16x1xi32>
    %8 = vector.broadcast %7 : vector<16x1xi32> to vector<16x128xi32>
    %9 = arith.cmpi eq, %6, %8 : vector<16x128xi32>
    %cst_7 = arith.constant 0.000000e+00 : f32
    %10 = vector.broadcast %cst_7 : f32 to vector<16x128xf32>
    %11 = arith.select %9, %5, %10 : vector<16x128xi1>, vector<16x128xf32>
    %cst_8 = arith.constant dense<0.000000e+00> : vector<16xf32>
    %12 = vector.multi_reduction <add>, %11, %cst_8 [1] : vector<16x128xf32> to vector<16xf32>
    %13 = vector.shape_cast %12 : vector<16xf32> to vector<16x1xf32>
    %cst_9 = arith.constant dense<0xFF800000> : vector<16xf32>
    %14 = vector.multi_reduction <maximumf>, %5, %cst_9 [1] : vector<16x128xf32> to vector<16xf32>
    %15 = vector.shape_cast %14 : vector<16xf32> to vector<16x1xf32>
    %16 = vector.broadcast %15 : vector<16x1xf32> to vector<16x128xf32>
    %17 = arith.subf %5, %16 : vector<16x128xf32>
    %18 = math.exp %17 : vector<16x128xf32>
    %19 = arith.truncf %18 : vector<16x128xf32> to vector<16x128xbf16>
    %c0_10 = arith.constant 0 : index
    %c0_11 = arith.constant 0 : index
    %20 = vector.load %arg4[%c0_10, %c0_11] : memref<128x128xbf16, #tpu.memory_space<vmem>>, vector<128x128xbf16>
    %cst_12 = arith.constant dense<0.000000e+00> : vector<16x128xf32>
    %21 = tpu.matmul %19, %20, %cst_12 {dimension_numbers = #tpu.dot_dimension_numbers<[1], [0], [0], [1], [0, 0, 1, 1], [], []>} : vector<16x128xbf16>, vector<128x128xbf16>, vector<16x128xf32> -> vector<16x128xf32>
    %22 = vector.extract_strided_slice %21 {offsets = [0, 0], sizes = [16, 4], strides = [1, 1]} : vector<16x128xf32> to vector<16x4xf32>
    %23 = vector.extract_strided_slice %21 {offsets = [0, 4], sizes = [16, 4], strides = [1, 1]} : vector<16x128xf32> to vector<16x4xf32>
    %24 = vector.extract_strided_slice %21 {offsets = [0, 8], sizes = [16, 1], strides = [1, 1]} : vector<16x128xf32> to vector<16x1xf32>
    %25 = tpu.iota {dimensions = array<i32: 0>} : vector<16x1xi32>
    %c16_i32 = arith.constant 16 : i32
    %26 = arith.muli %arg0, %c16_i32 : i32
    %27 = vector.broadcast %26 : i32 to vector<16x1xi32>
    %28 = arith.addi %25, %27 : vector<16x1xi32>
    %c24_i32 = arith.constant 24 : i32
    %29 = vector.broadcast %c24_i32 : i32 to vector<16x1xi32>
    %30 = arith.cmpi slt, %28, %29 : vector<16x1xi32>
    %31 = arith.extui %30 : vector<16x1xi1> to vector<16x1xi32>
    %32 = arith.sitofp %31 : vector<16x1xi32> to vector<16x1xf32>
    %33 = math.log %24 : vector<16x1xf32>
    %34 = arith.addf %15, %33 : vector<16x1xf32>
    %35 = arith.subf %34, %13 : vector<16x1xf32>
    %36 = arith.mulf %32, %35 : vector<16x1xf32>
    %cst_13 = arith.constant dense<0.000000e+00> : vector<1xf32>
    %37 = vector.multi_reduction <add>, %36, %cst_13 [0] : vector<16x1xf32> to vector<1xf32>
    %38 = vector.shape_cast %37 : vector<1xf32> to vector<1x1xf32>
    %cst_14 = arith.constant 9.99999991E-38 : f32
    %39 = vector.broadcast %cst_14 : f32 to vector<16x4xf32>
    %40 = arith.maximumf %22, %39 : vector<16x4xf32>
    %41 = math.log %40 : vector<16x4xf32>
    %cst_15 = arith.constant 9.99999991E-38 : f32
    %42 = vector.broadcast %cst_15 : f32 to vector<16x4xf32>
    %43 = arith.maximumf %23, %42 : vector<16x4xf32>
    %44 = math.log %43 : vector<16x4xf32>
    %45 = arith.subf %41, %44 : vector<16x4xf32>
    %c0_16 = arith.constant 0 : index
    %c0_17 = arith.constant 0 : index
    %46 = vector.load %arg6[%c0_16, %c0_17] : memref<16x4xf32, #tpu.memory_space<vmem>>, vector<16x4xf32>
    %47 = vector.broadcast %32 : vector<16x1xf32> to vector<16x4xf32>
    %48 = arith.mulf %46, %47 : vector<16x4xf32>
    %49 = vector.shape_cast %38 : vector<1x1xf32> to vector<1x1x1xf32>
    %c0_18 = arith.constant 0 : index
    %c0_19 = arith.constant 0 : index
    %c0_20 = arith.constant 0 : index
    %50 = vector.load %arg7[%c0_18, %c0_19, %c0_20] : memref<1x1x1xf32, #tpu.memory_space<vmem>>, vector<1x1x1xf32>
    tpu.vector_store %arg7[%c0_18, %c0_19, %c0_20], %49 {strides = array<i32>} : memref<1x1x1xf32, #tpu.memory_space<vmem>>, vector<1x1x1xf32>,
    %51 = arith.mulf %48, %45 : vector<16x4xf32>
    %cst_21 = arith.constant dense<0.000000e+00> : vector<4xf32>
    %52 = vector.multi_reduction <add>, %51, %cst_21 [0] : vector<16x4xf32> to vector<4xf32>
    %53 = vector.shape_cast %52 : vector<4xf32> to vector<1x4xf32>
    %54 = vector.shape_cast %53 : vector<1x4xf32> to vector<1x1x4xf32>
    %c0_22 = arith.constant 0 : index
    %c0_23 = arith.constant 0 : index
    %c0_24 = arith.constant 0 : index
    %55 = vector.load %arg8[%c0_22, %c0_23, %c0_24] : memref<1x1x4xf32, #tpu.memory_space<vmem>>, vector<1x1x4xf32>
    tpu.vector_store %arg8[%c0_22, %c0_23, %c0_24], %54 {strides = array<i32>} : memref<1x1x4xf32, #tpu.memory_space<vmem>>, vector<1x1x4xf32>,
    %cst_25 = arith.constant dense<0.000000e+00> : vector<4xf32>
    %56 = vector.multi_reduction <add>, %48, %cst_25 [0] : vector<16x4xf32> to vector<4xf32>
    %57 = vector.shape_cast %56 : vector<4xf32> to vector<1x4xf32>
    %58 = vector.shape_cast %57 : vector<1x4xf32> to vector<1x1x4xf32>
    %c0_26 = arith.constant 0 : index
    %c0_27 = arith.constant 0 : index
    %c0_28 = arith.constant 0 : index
    %59 = vector.load %arg9[%c0_26, %c0_27, %c0_28] : memref<1x1x4xf32, #tpu.memory_space<vmem>>, vector<1x1x4xf32>
    tpu.vector_store %arg9[%c0_26, %c0_27, %c0_28], %58 {strides = array<i32>} : memref<1x1x4xf32, #tpu.memory_space<vmem>>, vector<1x1x4xf32>,
    return
  }
  func.func @transform_0(%arg0: i32) -> (i32, i32) {
    %c0_i32 = arith.constant 0 : i32
    %c0_i32_0 = arith.constant 0 : i32
    return %arg0, %c0_i32 : i32, i32
  }
  func.func @transform_1(%arg0: i32) -> (i32, i32) {
    %c0_i32 = arith.constant 0 : i32
    %c0_i32_0 = arith.constant 0 : i32
    %c0_i32_1 = arith.constant 0 : i32
    return %c0_i32, %c0_i32_0 : i32, i32
  }
  func.func @transform_2(%arg0: i32) -> (i32, i32) {
    %c0_i32 = arith.constant 0 : i32
    %c0_i32_0 = arith.constant 0 : i32
    %c0_i32_1 = arith.constant 0 : i32
    return %c0_i32, %c0_i32_0 : i32, i32
  }
  func.func @transform_3(%arg0: i32) -> (i32, i32) {
    %c0_i32 = arith.constant 0 : i32
    %c0_i32_0 = arith.constant 0 : i32
    %c0_i32_1 = arith.constant 0 : i32
    return %c0_i32, %c0_i32_0 : i32, i32
  }
  func.func @transform_4(%arg0: i32) -> (i32, i32) {
    %c0_i32 = arith.constant 0 : i32
    %c0_i32_0 = arith.constant 0 : i32
    return %arg0, %c0_i32 : i32, i32
  }
  func.func @transform_5(%arg0: i32) -> (i32, i32) {
    %c0_i32 = arith.constant 0 : i32
    %c0_i32_0 = arith.constant 0 : i32
    return %arg0, %c0_i32 : i32, i32
  }
  func.func @transform_6(%arg0: i32) -> (i32, i32, i32) {
    %c0_i32 = arith.constant 0 : i32
    %c0_i32_0 = arith.constant 0 : i32
    %c0_i32_1 = arith.constant 0 : i32
    return %arg0, %c0_i32, %c0_i32_0 : i32, i32, i32
  }
  func.func @transform_7(%arg0: i32) -> (i32, i32, i32) {
    %c0_i32 = arith.constant 0 : i32
    %c0_i32_0 = arith.constant 0 : i32
    %c0_i32_1 = arith.constant 0 : i32
    return %arg0, %c0_i32, %c0_i32_0 : i32, i32, i32
  }
  func.func @transform_8(%arg0: i32) -> (i32, i32, i32) {
    %c0_i32 = arith.constant 0 : i32
    %c0_i32_0 = arith.constant 0 : i32
    %c0_i32_1 = arith.constant 0 : i32
    return %arg0, %c0_i32, %c0_i32_0 : i32, i32, i32
  }
}

</mosaic_0001>

<bundles_post_ra>
// kernel: tpu_custom_call.1
= control target key start
LH: loop header
LB: loop body
LE: loop exit
PB: predicated region body
PF: predicated region fallthrough
CT: control target
= control target key end

     0   :  { %14 = vsyncpa [#allocation3], 0  ;;  %s1660_s0 = inlined_call_operand.hbm [shape: bf16[32,128], index: 0, kind: input, shape index: {}]   ;;  %s1661_s1 = inlined_call_operand.vmem [shape: bf16[128,128], index: 1, kind: input, shape index: {}]   ;;  %s1662_s2 = inlined_call_operand.vmem [shape: f32[1,128], index: 2, kind: input, shape index: {}]   ;;  %s1663_s3 = inlined_call_operand.hbm [shape: bf16[128,128], index: 3, kind: input, shape index: {}]   ;;  %s1664_s4 = inlined_call_operand.vmem [shape: s32[32,1], index: 4, kind: input, shape index: {}]   ;;  %s1665_s5 = inlined_call_operand.vmem [shape: f32[32,4], index: 5, kind: input, shape index: {}]   ;;  %s1666_s6 = inlined_call_operand.vmem [shape: f32[2,1,1], index: 6, kind: output, shape index: {0}]   ;;  %s1667_s7 = inlined_call_operand.hbm [shape: f32[2,1,4], index: 7, kind: output, shape index: {1}]   ;;  %s1668_s8 = inlined_call_operand.hbm [shape: f32[2,1,4], index: 8, kind: output, shape index: {2}]  }
   0x1   :  { %16 = vsyncpa [#allocation3 + $0x1], 0 }
   0x2   :  { %17 = vsyncpa [#allocation6], 0 }
   0x3   :  { %18 = vsyncpa [#allocation4], 0 }
   0x4   :  { %20 = vsyncpa [#allocation4 + $0x1], 0 }
   0x5   :  { %21 = vsyncpa [#allocation9], 0 }
   0x6   :  { %23 = vsyncpa [#allocation9 + $0x1], 0  ;;  %s1338_s27 = smov 0   ;;  %s1340_s28 = smov 0  }
   0x7   :  { %s1342_s29 = smov 0   ;;  %s1344_s30 = smov 0  }
   0x8 LB: > { %s1359_s9 = sadd.s32 4294967295, %s1280_s30   ;;  %s922_s10 = sadd.s32 4294967294, %s1280_s30   ;;  %s1280_s30 = sphi %s1344_s30, %s1690_s30   ;;  %s1276_s29 = sphi %s1342_s29, %s1693_s29   ;;  %s1272_s28 = sphi %s1340_s28, %s1692_s28   ;;  %s1268_s27 = sphi %s1338_s27, %s1691_s27  }
   0x9   : > { %p49_p0 = scmp.ne.s32.totalorder %s1272_s28, %s1268_s27  ;;  %p1669_p1 = scmp.eq.s32.totalorder %s1359_s9, 0 }
   0xa   : > { %p220_p3 = scmp.eq.s32.totalorder %s922_s10, 1  ;;  %p923_p5 = scmp.ge.s32.totalorder %s1280_s30, 1 }
   0xb   : > { %p1368_p4 = por %p1669_p1, %p49_p0  ;;  %p253_p7 = scmp.lt.s32.totalorder %s1280_s30, 3 }
   0xc   : > { %p1373_p6 = por %p220_p3, %p49_p0  ;;  %s1282_s14 = smov [#allocation5]  }
   0xd   : > { %s1675_s11 = scalar_select %p1368_p4, 1, 0 }
   0xe   : > { %s1676_s12 = scalar_select %p1373_p6, 1, 0 }
   0xf   : > { %p1378_p8 = pnand %p923_p5, %p253_p7  ;;  %s271_s15 = sshll.u32 %s1282_s14, 4  ;;  %s1382_s15 = int_to_ptr.vmem [resolvable:$true] %s271_s15 }
  0x10   : > { %s1394_s17 = sadd.s32 1, %s1280_s30   ;;  %s36_s18 = sadd.s32 1, %s1276_s29 }
  0x11   : > { %s1677_s13 = scalar_select %p1378_p8, 1, 0 }
  0x12   : > { %p1030_p9 = pneg %p1378_p8  ;;  %1679 = sst [smem:[#allocation14_spill]] %s1394_s17 }
  0x13   : > { %s33_s19 = ssub.s32 %s1280_s30, %s1394_s17  ;;  %s1120_s22 = scalar_lea.hbm %s1663_s3, 1024 }
  0x14   : > { %p1389_p11 = pnand %p1030_p9, %p1669_p1  ;;  %p1121_p12 = scmp.ne.s32.totalorder %s1663_s3, %s1120_s22 }
  0x15   : > { %p1127_p5 = scmp.lt.u32.totalorder %s1120_s22, %s1663_s3 }
  0x16   : > { %p1122_p13 = pneg %p1389_p11 }
  0x18   : > { %p1123_p0 = pnand %p1122_p13, %p1121_p12 }
  0x1a   : > { %p1124_p3 = pneg %p1123_p0 }
  0x1c   : > { %p1129_p7 = pnand %p1127_p5, %p1124_p3 }
  0x1e   : > { %1132 = shalt.err (!%p1129_p7)
}
  0x1f   : > { %s1133_s10 = scalar_lea.vmem %s1382_s15, 1024  ;;  %p1141_p2 = scmp.lt.s32.totalorder %s1382_s15, %s1382_s15 }
  0x20   : > { %p1134_p9 = scmp.ne.s32.totalorder %s1382_s15, %s1133_s10  ;;  %p1142_p6 = scmp.lt.s32.totalorder %s1133_s10, %s1133_s10 }
  0x22   : > { %p1136_p10 = pnand %p1134_p9, %p1122_p13  ;;  %p1143_p4 = por %p1142_p6, %p1141_p2 }
  0x24   : > { %p1137_p1 = pneg %p1136_p10 }
  0x26   : > { %p1144_p8 = pnand %p1143_p4, %p1137_p1 }
  0x28   : > { %1147 = shalt.err (!%p1144_p8)
}
  0x29   : > { %s1674_s14 = smov 64   ;;  %s1284_s20 = smov 4  }
  0x2a   : > { %1033 = dma.hbm_to_vmem [thread:$0]  (!%p1389_p11), %s1663_s3, 1024, %s1382_s15, [#allocation6], %s1674_s14, %s1674_s14, %s1284_s20  }
  0x2b   : > { %p34_p1 = scmp.eq.s32.totalorder %s33_s19, 0  ;;  %p43_p2 = scmp.ne.s32.totalorder %s1276_s29, %s1272_s28 }
  0x2c   : > { %p44_p4 = scmp.eq.s32.totalorder %s1280_s30, 0  ;;  %p1046_p6 = scmp.lt.s32.totalorder %s1280_s30, 2 }
  0x2d   : > { %s1428_s23 = scalar_select %p34_p1, %s1276_s29, %s36_s18  }
  0x2e   : > { %p45_p8 = por %p44_p4, %p43_p2  ;;  %p1680_p10 = scmp.eq.s32.totalorder %s1359_s9, 1 }
  0x2f   : > { %s285_s16 = sand.u32 1, %s1276_s29   ;;  %s961_s25 = sshll.u32 %s1280_s30, 7 }
  0x30   : > { %p1432_p12 = por %p1680_p10, %p43_p2  ;;  %s926_s26 = sshll.u32 %s285_s16, 3 }
  0x31   : > { %s1441_s21 = scalar_lea.hbm %s1660_s0, %s961_s25  ;;  %s289_s15 = scalar_lea.vmem [#allocation2], %s926_s26 }
  0x32   : > { %s296_s18 = sshll.u32 %s289_s15, 4  ;;  %p1443_p11 = pnand %p1046_p6, %p45_p8  ;;  %s1447_s18 = int_to_ptr.vmem [resolvable:$true] %s296_s18 }
  0x33   : > { %s1449_s22 = scalar_lea.sflag [#allocation3], %s285_s16  ;;  %s1148_s14 = scalar_lea.hbm %s1441_s21, 128 }
  0x34   : > { %p1149_p13 = scmp.ne.s32.totalorder %s1441_s21, %s1148_s14  ;;  %p1150_p0 = pneg %p1443_p11 }
  0x35   : > { %s1153_s26 = scalar_lea.hbm %s1660_s0, 256  ;;  %p1154_p7 = scmp.lt.u32.totalorder %s1441_s21, %s1660_s0 }
  0x36   : > { %p1151_p3 = pnand %p1150_p0, %p1149_p13  ;;  %p1155_p9 = scmp.lt.u32.totalorder %s1153_s26, %s1148_s14 }
  0x37   : > { %p1157_p2 = scmp.lt.u32.totalorder %s1148_s14, %s1441_s21 }
  0x38   : > { %p1152_p5 = pneg %p1151_p3  ;;  %p1156_p1 = por %p1155_p9, %p1154_p7 }
  0x3a   : > { %p1158_p4 = por %p1157_p2, %p1156_p1 }
  0x3c   : > { %p1159_p6 = pnand %p1158_p4, %p1152_p5 }
  0x3e   : > { %1162 = shalt.err (!%p1159_p6)
}
  0x3f   : > { %s1163_s16 = scalar_lea.vmem %s1447_s18, 128  ;;  %s1285_s17 = smov [#allocation2]  }
  0x40   : > { %p1164_p8 = scmp.ne.s32.totalorder %s1447_s18, %s1163_s16  ;;  %s1168_s25 = sshll.u32 %s1285_s17, 4  ;;  %s1169_s25 = int_to_ptr.vmem [resolvable:$false] %s1168_s25 }
  0x41   : > { %s1170_s10 = scalar_lea.vmem %s1169_s25, 256  ;;  %p1171_p3 = scmp.lt.s32.totalorder %s1447_s18, %s1169_s25 }
  0x42   : > { %p1166_p10 = pnand %p1164_p8, %p1150_p0  ;;  %p1172_p7 = scmp.lt.s32.totalorder %s1170_s10, %s1163_s16 }
  0x44   : > { %p1167_p13 = pneg %p1166_p10  ;;  %p1173_p9 = por %p1172_p7, %p1171_p3 }
  0x46   : > { %p1174_p1 = pnand %p1173_p9, %p1167_p13 }
  0x48   : > { %1177 = shalt.err (!%p1174_p1)
}
  0x49   : > { %s1683_s14 = smov 64   ;;  %p1684_p0 = scmp.ne.s32.totalorder %s1677_s13, 0 }
  0x4a   : > { %1037 = dma.hbm_to_vmem [thread:$0]  (!%p1443_p11), %s1441_s21, 128, %s1447_s18, %s1449_s22, %s1683_s14, %s1683_s14, %s1284_s20  }
  0x4b   : > { %326 = sbr.rel (%p1684_p0) target bundleno = 887 (0x377), region = 44  ;;  %s1483_s26 = sand.u32 (!%p1684_p0), 1, %s1272_s28  }
  0x4c   : > { %s930_s15 = sshll.u32 (!%p1684_p0), %s1483_s26, 3  ;;  %s329_s16 = scalar_lea.sflag (!%p1684_p0), [#allocation3], %s1483_s26 }
  0x4d   : > { %s1487_s17 = scalar_lea.vmem (!%p1684_p0), [#allocation2], %s930_s15  ;;  %p1685_p5 = scmp.ne.s32.totalorder (!%p1684_p0), %s1675_s11, 0 }
  0x52   : > { %1251 = dma.done.wait (%p1685_p5), %s329_s16, 128  }
  0x53   : > { %1253 = vsyncadd (%p1685_p5), %s329_s16, 4294967168  ;;  %p1686_p11 = scmp.eq.s32.totalorder %s1359_s9, 0 }
  0x55   : > { %1255 = dma.done.wait (%p1686_p11), [#allocation6], 1024   ;;  %p1687_p2 = pmov %p1686_p11 }
  0x56   : > { %s932_s13 = sshll.u32 %s1359_s9, 1  ;;  %v1286_v0 = vmov 0.0   ;;  %vm1287_vm0 = vmmov 0   ;;  %v1288_v1 = vmov 0   ;;  %v1091_v2 = vld [vmem:[%s1661_s1] sm:$0xff]   ;;  %v1092_v3 = vld [vmem:[%s1661_s1 + $0x8] sm:$0xff]   ;;  %v522_v17 = vlaneseq }
  0x57   : > { %1257 = vsyncadd (%p1687_p2), [#allocation6], 4294966272  ;;  %980 = vmatprep.subr.bf16.mxu0 %v1286_v0  ;;  %996 = vmatprep.mubr.msk.bf16.mxu0 %vm1287_vm0, %v1286_v0  ;;  %p387_p4 = scmp.lt.s32.totalorder %s932_s13, 3  ;;  %v1093_v4 = vld [vmem:[%s1661_s1 + $0x10] sm:$0xff]   ;;  %v1094_v6 = vld [vmem:[%s1661_s1 + $0x18] sm:$0xff]   ;;  %vm717_vm5 = vcmask 31744  }
  0x58   : > { %1089 = vset.pattern.permute.xlu1 %v1288_v1  ;;  %1000 = vmatprep.subr.bf16.mxu1 %v1286_v0  ;;  %v1095_v8 = vld [vmem:[%s1661_s1 + $0x20] sm:$0xff]   ;;  %v1096_v9 = vld [vmem:[%s1661_s1 + $0x28] sm:$0xff]   ;;  %v1097_v10 = vld [vmem:[%s1661_s1 + $0x30] sm:$0xff]   ;;  %v523_v20 = vand.u32 127, %v522_v17  ;;  %v657_v43 = vshrl.u32 %v522_v17, 7  ;;  %vm679_vm6 = vcmask 72768  }
  0x59   : > { %1016 = vmatprep.mubr.msk.bf16.mxu1 %vm1287_vm0, %v1286_v0  ;;  %1090 = vset.pattern.permute.xlu0 %v1288_v1  ;;  %s1695_s13 = smov (!%p387_p4, %s932_s13), 3  ;;  %v1098_v11 = vld [vmem:[%s1661_s1 + $0x38] sm:$0xff]   ;;  %v1099_v12 = vld [vmem:[%s1487_s17] sm:$0xff]   ;;  %v1100_v13 = vld [vmem:[#allocation5] sm:$0xff]   ;;  %s1553_s17 = sshll.u32 %s1359_s9, 4  ;;  %vm727_vm7 = vcmask 24576  }
  0x5a   : > { %981 = vmatpush3.bf16.msra.mxu0 %v1091_v2  ;;  %s933_s19 = sshll.u32 %s1695_s13, 3  ;;  %1001 = vmatpush3.bf16.msra.mxu1 %v1100_v13  ;;  %v1101_v14 = vld [vmem:[#allocation5 + $0x8] sm:$0xff]   ;;  %v1102_v15 = vld [vmem:[#allocation5 + $0x10] sm:$0xff]   ;;  %v1103_v29 = vld [vmem:[#allocation5 + $0x18] sm:$0xff]   ;;  %v660_v44 = vstv %s1553_s17  ;;  %v658_v49 = vadd.s32 8, %v657_v43  ;;  %s1289_s13 = smov 124  }
  0x5b   : > { %982 = vmatprep.subr.bf16.mxu0 %v1286_v0  ;;  %s390_s15 = scalar_lea.vmem %s1664_s4, %s933_s19  ;;  %1002 = vmatprep.subr.bf16.mxu1 %v1286_v0  ;;  %v936_v18 = vld [vmem:[%s1662_s2] ss:$0 sm:$0xff]  ;;  %v1104_v30 = vld [vmem:[#allocation5 + $0x20] sm:$0xff]   ;;  %v1105_v31 = vld [vmem:[#allocation5 + $0x28] sm:$0xff]   ;;  %v661_v45 = vadd.s32 %v660_v44, %v657_v43  ;;  %s396_s18 = scalar_lea.vmem %s1665_s5, %s933_s19 }
  0x5c   : > { %v524_v5 = vld [vmem:[%s390_s15] sm:$0xff]  ;;  %v525_v7 = vld [vmem:[%s390_s15 + $0x8] sm:$0xff]  ;;  %v662_v50 = vadd.s32 %v660_v44, %v658_v49  ;;  %s384_s19 = scalar_lea.vmem [#allocation8], %s1483_s26  ;;  %s1580_s10 = scalar_lea.hbm %s1668_s8, %s1553_s17 }
  0x5d   : > { %527 = vperm.xlu1 %1089, %v524_v5   ;;  %v1106_v32 = vld [vmem:[#allocation5 + $0x30] sm:$0xff]   ;;  %v1107_v33 = vld [vmem:[#allocation5 + $0x38] sm:$0xff]   ;;  %vm663_vm3 = vcmp.lt.s32.totalorder %v661_v45, 24  ;;  %s775_s14 = sshll.u32 %s384_s19, 4  ;;  %s747_s15 = scalar_lea.sflag [#allocation9], %s1483_s26  ;;  %s776_s14 = int_to_ptr.vmem [resolvable:$true] %s775_s14 }
  0x5e   : > { %983 = vmatpush3.bf16.msra.mxu0 %v1092_v3  ;;  %1003 = vmatpush3.bf16.msra.mxu1 %v1101_v14  ;;  %v705_v46 = vld [vmem:[%s396_s18] sm:$0xff]  ;;  %v955_v47 = vsel %vm663_vm3, 1.0, %v1286_v0  ;;  %vm664_vm4 = vcmp.lt.s32.totalorder %v662_v50, 24  ;;  %v706_v57 = vld [vmem:[%s396_s18 + $0x8] sm:$0xff]  ;;  %s1178_s16 = scalar_lea.vmem %s776_s14, 16  ;;  %s1290_s11 = smov [#allocation8]  }
  0x5f   : > { %984 = vmatprep.subr.bf16.mxu0 %v1286_v0  ;;  %1004 = vmatprep.subr.bf16.mxu1 %v1286_v0  ;;  %v1562_v48 = vmul.f32 %v955_v47, %v705_v46  ;;  %v956_v58 = vsel %vm664_vm4, 1.0, %v1286_v0  ;;  %p1179_p6 = scmp.ne.s32.totalorder %s776_s14, %s1178_s16  ;;  %s1182_s20 = sshll.u32 %s1290_s11, 4  ;;  %s1183_s20 = int_to_ptr.vmem [resolvable:$false] %s1182_s20 }
  0x60   : > { %v1567_v60 = vmul.f32 %v956_v58, %v706_v57  ;;  %s1184_s21 = scalar_lea.vmem %s1183_s20, 32  ;;  %p1185_p13 = scmp.lt.s32.totalorder %s776_s14, %s1183_s20 }
  0x61   : > { %530 = vperm.xlu1 %1089, %v525_v7   ;;  %v729_v59 = vsel %vm717_vm5, %v1562_v48, 0.0  ;;  %p1180_p8 = pnand %p1179_p6, %p1432_p12  ;;  %p1186_p3 = scmp.lt.s32.totalorder %s1184_s21, %s1178_s16 }
  0x62   : > { %985 = vmatpush3.bf16.msra.mxu0 %v1093_v4  ;;  %1005 = vmatpush3.bf16.msra.mxu1 %v1102_v15  ;;  %v730_v61 = vsel %vm717_vm5, %v1567_v60, 0.0 }
  0x63   : > { %986 = vmatprep.subr.bf16.mxu0 %v1286_v0  ;;  %1006 = vmatprep.subr.bf16.mxu1 %v1286_v0  ;;  %v731_v62 = vadd.f32 %v730_v61, %v729_v59  ;;  %p1181_p10 = pneg %p1180_p8  ;;  %p1187_p7 = por %p1186_p3, %p1185_p13 }
  0x65   : > { %v732_v2 = vrot.slane %v731_v62, 4  ;;  %p1188_p9 = pnand %p1187_p7, %p1181_p10 }
  0x66   : > { %987 = vmatpush3.bf16.msra.mxu0 %v1094_v6  ;;  %1007 = vmatpush3.bf16.msra.mxu1 %v1103_v29 }
  0x67   : > { %988 = vmatprep.subr.bf16.mxu0 %v1286_v0  ;;  %1008 = vmatprep.subr.bf16.mxu1 %v1286_v0  ;;  %v733_v7 = vadd.f32 %v732_v2, %v731_v62 }
  0x6a   : > { %989 = vmatpush3.bf16.msra.mxu0 %v1095_v8  ;;  %1009 = vmatpush3.bf16.msra.mxu1 %v1104_v30 }
  0x6b   : > { %990 = vmatprep.subr.bf16.mxu0 %v1286_v0  ;;  %1010 = vmatprep.subr.bf16.mxu1 %v1286_v0 }
  0x6e   : > { %991 = vmatpush3.bf16.msra.mxu0 %v1096_v9  ;;  %1011 = vmatpush3.bf16.msra.mxu1 %v1105_v31 }
  0x6f   : > { %992 = vmatprep.subr.bf16.mxu0 %v1286_v0  ;;  %1012 = vmatprep.subr.bf16.mxu1 %v1286_v0 }
  0x72   : > { %993 = vmatpush3.bf16.msra.mxu0 %v1097_v10  ;;  %1013 = vmatpush3.bf16.msra.mxu1 %v1106_v32 }
  0x73   : > { %994 = vmatprep.subr.bf16.mxu0 %v1286_v0  ;;  %1014 = vmatprep.subr.bf16.mxu1 %v1286_v0 }
  0x76   : > { %995 = vmatpush3.bf16.msra.mxu0 %v1098_v11  ;;  %1015 = vmatpush3.bf16.msra.mxu1 %v1107_v33  ;;  %v734_v11 = vrot.slane %v733_v7, 2 }
  0x79   : > { %997 = vmatmul.mubr.bf16.vlgmr.msra.gmra.mrb[0].mxu0 %v1099_v12 }
  0xdc   : > { %v528_v16 = vpop.permute.xlu1 %527 }
  0xdd   : > { %vm532_vm2 = vcmp.eq.s32.totalorder %v523_v20, %v528_v16  ;;  %v735_v16 = vadd.f32 %v734_v11, %v733_v7 }
  0xe0   : > { %v531_v19 = vpop.permute.xlu1 %530 }
  0xe1   : > { %vm533_vm1 = vcmp.eq.s32.totalorder %v523_v20, %v531_v19 }
 0x14c   : > { %v515_v21 = vpop.f32.mrb[0].mxu0 }
 0x14d   : > { %v516_v22 = vadd.f32 %v936_v18, %v515_v21  ;;  %v998_v23 = vpop.f32.mrb[1].mxu0 }
 0x14e   : > { %v518_v24 = vpop.f32.mrb[2].mxu0 }
 0x14f   : > { %v519_v25 = vadd.f32 %v936_v18, %v518_v24  ;;  %540 = vmax.xlane.f32.xlu0 %v516_v22  ;;  %v999_v26 = vpop.f32.mrb[3].mxu0  ;;  %v534_v28 = vsel %vm532_vm2, %v516_v22, 0.0  ;;  %v736_v18 = vrot.slane %v735_v16, 1 }
 0x151   : > { %v535_v27 = vsel %vm533_vm1, %v519_v25, 0.0  ;;  %v737_v20 = vadd.f32 %v736_v18, %v735_v16 }
 0x152   : > { %538 = vadd.xlane.f32.xlu1 %v535_v27 }
 0x153   : > { %542 = vmax.xlane.f32.xlu0 %v519_v25  ;;  %738 = vst.msk [vmem:[%s384_s19] sm:$0x1] %vm727_vm7, %v737_v20 }
 0x157   : > { %536 = vadd.xlane.f32.xlu0 %v534_v28 }
 0x1dc   : > { %v541_v34 = vpop.xlane.xlu0 %540 }
 0x1dd   : > { %v544_v35 = vsub.f32 %v516_v22, %v541_v34 }
 0x1df   : > { %v546_v36 = vmul.f32 1.442695, %v544_v35  ;;  %v539_v13 = vpop.xlane.xlu1 %538 }
 0x1e0   : > { %v543_v37 = vpop.xlane.xlu0 %542 }
 0x1e1   : > { %v545_v38 = vsub.f32 %v519_v25, %v543_v37  ;;  %1108 = vpow2.f32 %v546_v36 }
 0x1e3   : > { %v548_v39 = vmul.f32 1.442695, %v545_v38 }
 0x1e4   : > { %v537_v8 = vpop.xlane.xlu0 %536 }
 0x1e5   : > { %1110 = vpow2.f32 %v548_v39 }
 0x1eb   : > { %v1109_v40 = vpop.eup %1108 }
 0x1ef   : > { %v1111_v41 = vpop.eup %1110 }
 0x1f0   : > { %v550_v42 = vpack.c.bf16 %v1111_v41, %v1109_v40 }
 0x1f2   : > { %1017 = vmatmul.mubr.bf16.vlgmr.msra.gmra.mrb[0].mxu1 %v550_v42 }
 0x2c5   : > { %v649_v51 = vpop.f32.mrb[0].mxu1 }
 0x2c6   : > { %1112 = vlog2.f32 %v649_v51  ;;  %v689_v52 = vmax.f32 %v649_v51, 1e-37  ;;  %v1018_v53 = vpop.f32.mrb[1].mxu1 }
 0x2c7   : > { %v652_v54 = vpop.f32.mrb[2].mxu1 }
 0x2c8   : > { %1114 = vlog2.f32 %v689_v52  ;;  %v690_v55 = vmax.f32 %v652_v54, 1e-37  ;;  %v1019_v56 = vpop.f32.mrb[3].mxu1 }
 0x2c9   : > { %1116 = vlog2.f32 %v652_v54 }
 0x2ca   : > { %1118 = vlog2.f32 %v690_v55 }
 0x2d0   : > { %v1113_v63 = vpop.eup %1112 }
 0x2d1   : > { %v670_v1 = vmul.f32 0.6931472, %v1113_v63 }
 0x2d2   : > { %v1115_v3 = vpop.eup %1114 }
 0x2d3   : > { %v1117_v4 = vpop.eup %1116  ;;  %v673_v5 = vadd.f32 %v670_v1, %v541_v34  ;;  %v1571_v6 = vmul.f32 0.6931472, %v1115_v3 }
 0x2d4   : > { %v1119_v0 = vpop.eup %1118  ;;  %v672_v9 = vmul.f32 0.6931472, %v1117_v4 }
 0x2d5   : > { %v675_v10 = vsub.f32 %v673_v5, %v537_v8  ;;  %697 = vrot.lane.b32.xlu0 %v1571_v6, %s1289_s13  ;;  %v694_v15 = vmul.f32 0.6931472, %v1119_v0 }
 0x2d6   : > { %v674_v12 = vadd.f32 %v672_v9, %v543_v37 }
 0x2d7   : > { %v677_v14 = vmul.f32 %v955_v47, %v675_v10 }
 0x2d8   : > { %v676_v17 = vsub.f32 %v674_v12, %v539_v13 }
 0x2d9   : > { %699 = vrot.lane.b32.xlu0 %v694_v15, %s1289_s13  ;;  %v680_v21 = vsel %vm679_vm6, %v677_v14, 0.0 }
 0x2da   : > { %v678_v19 = vmul.f32 %v956_v58, %v676_v17 }
 0x2dc   : > { %v681_v22 = vsel %vm679_vm6, %v678_v19, 0.0 }
 0x2dd   : > { %v682_v23 = vadd.f32 %v681_v22, %v680_v21 }
 0x2df   : > { %v683_v24 = vrot.slane %v682_v23, 4 }
 0x2e1   : > { %v684_v25 = vadd.f32 %v683_v24, %v682_v23 }
 0x2e3   : > { %v685_v26 = vrot.slane %v684_v25, 2 }
 0x2e4   : > { %1191 = shalt.err (!%p1188_p9)
}
 0x2e5   : > { %s1192_s18 = scalar_lea.hbm %s1580_s10, 16  ;;  %s1196_s22 = scalar_lea.hbm %s1668_s8, 32 }
 0x2e6   : > { %p1193_p1 = scmp.ne.s32.totalorder %s1580_s10, %s1192_s18  ;;  %p1197_p11 = scmp.lt.u32.totalorder %s1580_s10, %s1668_s8 }
 0x2e7   : > { %p1198_p2 = scmp.lt.u32.totalorder %s1196_s22, %s1192_s18  ;;  %p1200_p6 = scmp.lt.u32.totalorder %s1192_s18, %s1580_s10 }
 0x2e8   : > { %p1194_p0 = pnand %p1193_p1, %p1432_p12 }
 0x2e9   : > { %p1199_p4 = por %p1198_p2, %p1197_p11 }
 0x2ea   : > { %p1195_p5 = pneg %p1194_p0 }
 0x2eb   : > { %p1201_p8 = por %p1200_p6, %p1199_p4 }
 0x2ed   : > { %p1202_p10 = pnand %p1201_p8, %p1195_p5 }
 0x2ef   : > { %1205 = shalt.err (!%p1202_p10)
}
 0x2f0   : > { %1027 = dma.vmem_to_hbm [thread:$0]  (%p1432_p12), %s776_s14, 16, %s1580_s10, %s747_s15   ;;  %v686_v27 = vadd.f32 %v685_v26, %v684_v25  ;;  %vm713_vm8 = vcmask 0  }
 0x2f1   : > { %s1291_s16 = smov 120   ;;  %p398_p13 = scmp.lt.s32.totalorder %s1359_s9, 1 }
 0x2f2   : > { %v687_v28 = vrot.slane %v686_v27, 1  ;;  %s378_s10 = scalar_lea.vmem [#allocation7], %s1483_s26  ;;  %s1615_s19 = scalar_lea.hbm %s1667_s7, %s1553_s17 }
 0x2f3   : > { %s1697_s9 = smov (!%p398_p13, %s1359_s9), 1  ;;  %s762_s14 = sshll.u32 %s378_s10, 4  ;;  %s1617_s14 = int_to_ptr.vmem [resolvable:$true] %s762_s14 }
 0x2f4   : > { %v688_v29 = vadd.f32 %v687_v28, %v686_v27  ;;  %s400_s21 = scalar_lea.vmem %s1666_s6, %s1697_s9  ;;  %s743_s22 = scalar_lea.sflag [#allocation4], %s1483_s26 }
 0x2f5   : > { %s1206_s25 = scalar_lea.vmem %s1617_s14, 16  ;;  %s1292_s9 = smov [#allocation7]  }
 0x2f6   : > { %710 = vrot.lane.b32.xlu0 %v688_v29, %s1291_s16  ;;  %p1207_p3 = scmp.ne.s32.totalorder %s1617_s14, %s1206_s25  ;;  %s1210_s11 = sshll.u32 %s1292_s9, 4  ;;  %s1211_s11 = int_to_ptr.vmem [resolvable:$false] %s1210_s11 }
 0x2f7   : > { %s1212_s16 = scalar_lea.vmem %s1211_s11, 32  ;;  %p1213_p1 = scmp.lt.s32.totalorder %s1617_s14, %s1211_s11 }
 0x2f8   : > { %p1208_p7 = pnand %p1207_p3, %p1432_p12  ;;  %p1214_p0 = scmp.lt.s32.totalorder %s1212_s16, %s1206_s25 }
 0x2fa   : > { %p1209_p9 = pneg %p1208_p7  ;;  %p1215_p5 = por %p1214_p0, %p1213_p1 }
 0x2fc   : > { %p1216_p11 = pnand %p1215_p5, %p1209_p9 }
 0x347   : > { %v698_v30 = vpop.permute.xlu0 %697 }
 0x348   : > { %v703_v31 = vsub.f32 %v1571_v6, %v698_v30 }
 0x34a   : > { %v715_v33 = vmul.f32 %v1562_v48, %v703_v31 }
 0x34b   : > { %v700_v32 = vpop.permute.xlu0 %699 }
 0x34c   : > { %v704_v34 = vsub.f32 %v694_v15, %v700_v32  ;;  %v718_v36 = vsel %vm717_vm5, %v715_v33, 0.0 }
 0x34e   : > { %v716_v35 = vmul.f32 %v1567_v60, %v704_v34 }
 0x350   : > { %v719_v37 = vsel %vm717_vm5, %v716_v35, 0.0 }
 0x351   : > { %v720_v38 = vadd.f32 %v719_v37, %v718_v36 }
 0x353   : > { %v721_v39 = vrot.slane %v720_v38, 4 }
 0x355   : > { %v722_v40 = vadd.f32 %v721_v39, %v720_v38 }
 0x357   : > { %v723_v41 = vrot.slane %v722_v40, 2 }
 0x359   : > { %v724_v42 = vadd.f32 %v723_v41, %v722_v40 }
 0x35b   : > { %v725_v43 = vrot.slane %v724_v42, 1 }
 0x35d   : > { %v726_v44 = vadd.f32 %v725_v43, %v724_v42 }
 0x35f   : > { %728 = vst.msk [vmem:[%s378_s10] sm:$0x1] %vm727_vm7, %v726_v44 }
 0x368   : > { %v711_v45 = vpop.permute.xlu0 %710 }
 0x369   : > { %714 = vst.msk [vmem:[%s400_s21] sm:$0x1] %vm713_vm8, %v711_v45 }
 0x36a   : > { %1219 = shalt.err (!%p1216_p11)
}
 0x36b   : > { %s1220_s26 = scalar_lea.hbm %s1615_s19, 16  ;;  %s1224_s15 = scalar_lea.hbm %s1667_s7, 32 }
 0x36c   : > { %p1221_p2 = scmp.ne.s32.totalorder %s1615_s19, %s1220_s26  ;;  %p1225_p8 = scmp.lt.u32.totalorder %s1615_s19, %s1667_s7 }
 0x36d   : > { %p1226_p10 = scmp.lt.u32.totalorder %s1224_s15, %s1220_s26  ;;  %p1228_p3 = scmp.lt.u32.totalorder %s1220_s26, %s1615_s19 }
 0x36e   : > { %p1222_p4 = pnand %p1221_p2, %p1432_p12 }
 0x36f   : > { %p1227_p13 = por %p1226_p10, %p1225_p8 }
 0x370   : > { %p1223_p6 = pneg %p1222_p4 }
 0x371   : > { %p1229_p7 = por %p1228_p3, %p1227_p13 }
 0x373   : > { %p1230_p9 = pnand %p1229_p7, %p1223_p6 }
 0x375   : > { %1233 = shalt.err (!%p1230_p9)
}
 0x376   : > { %1026 = dma.vmem_to_hbm [thread:$0]  (%p1432_p12), %s1617_s14, 16, %s1615_s19, %s743_s22  }
 0x377 PF: > { %s793_s18 = sand.u32 1, %s1268_s27   ;;  %p1688_p1 = scmp.ne.s32.totalorder %s1676_s12, 0 }
 0x378   : > { %p1689_p0 = scmp.ge.s32.totalorder %s1280_s30, 2  ;;  %s794_s13 = scalar_lea.sflag [#allocation4], %s793_s18 }
 0x37a   : > { %p1039_p5 = pnand %p1689_p0, %p1688_p1 }
 0x37c   : > { %1259 = dma.done.wait (!%p1039_p5), %s794_s13, 16  }
 0x37d   : > { %1261 = vsyncadd (!%p1039_p5), %s794_s13, 4294967280  ;;  %s802_s25 = scalar_lea.sflag [#allocation9], %s793_s18 }
 0x37e   : > { %1263 = dma.done.wait (!%p1039_p5), %s802_s25, 16  }
 0x37f   : > { %1265 = vsyncadd (!%p1039_p5), %s802_s25, 4294967280  ;;  %s1690_s30 = sld [smem:[#allocation14_spill]]  ;;  %s1691_s27 = smov %s1272_s28 }
 0x380   : > { %s1692_s28 = smov %s1276_s29  ;;  %s1693_s29 = smov %s1428_s23 }
 0x385   : > { %p26_p12 = scmp.ge.s32.totalorder %s1690_s30, 4  }
 0x387   :  { %28 = sbr.rel (!%p26_p12) target bundleno = 8 (0x8), region = 128 }
 0x38e   :  { %806 = vsyncpa [#allocation3], 1 }
 0x38f   :  { %808 = vsyncpa [#allocation3 + $0x1], 1 }
 0x390   :  { %809 = vsyncpa [#allocation6], 1 }
 0x391   :  { %810 = vsyncpa [#allocation4], 1 }
 0x392   :  { %812 = vsyncpa [#allocation4 + $0x1], 1 }
 0x393   :  { %813 = vsyncpa [#allocation9], 1 }
 0x394   :  { %815 = vsyncpa [#allocation9 + $0x1], 1 }

</bundles_post_ra>
